<compile_context>
chip_gen: v6e
topology: v6e:2x2x1
jax: 0.10.0
libtpu: 0.0.40
codegen_flags: <defaults>
</compile_context>

<pallas_src>
import functools

import jax
import jax.numpy as jnp
import numpy as np
from jax.experimental import pallas as pl
from jax.experimental.pallas import tpu as pltpu

E = 768        # per-step feature dim (stand-in for the text encoder output)
H = 128        # GRU hidden size per direction
G = 3 * H      # r, z, n gates per direction
VOCAB = 1024   # synthetic vocabulary (real pretrained encoders not loaded)
NCLS = 2
NCLS_PAD = 128  # lane-dense padded FC output width (sliced to NCLS outside)

TC_CHUNK = 32   # GRU timesteps processed per grid step


# ----------------------------- tiled matmul + bias -----------------------------
def _matmul_bias_kernel(x_ref, w_ref, b_ref, o_ref):
    o_ref[...] = (jnp.dot(x_ref[...], w_ref[...],
                          preferred_element_type=jnp.float32)
                  + b_ref[...]).astype(o_ref.dtype)


def matmul_bias(x, w, b, *, tm=512):
    """y = x @ w + b. x/w may be bf16; accumulation and output are f32.

    Tiled over rows so the projection pipelines HBM DMA and keeps the per-block
    VMEM footprint small enough for every generation (incl. v7x's 64 MiB)."""
    M, K = x.shape
    _, N = w.shape
    tm = min(tm, M)
    return pl.pallas_call(
        _matmul_bias_kernel,
        out_shape=jax.ShapeDtypeStruct((M, N), jnp.float32),
        grid=(pl.cdiv(M, tm),),
        in_specs=[pl.BlockSpec((tm, K), lambda i: (i, 0)),
                  pl.BlockSpec((K, N), lambda i: (0, 0)),
                  pl.BlockSpec((1, N), lambda i: (0, 0))],
        out_specs=pl.BlockSpec((tm, N), lambda i: (i, 0)),
        compiler_params=pltpu.CompilerParams(
            dimension_semantics=("parallel",)),
    )(x, w, b.reshape(1, N).astype(jnp.float32))


# ------------------- chunked bidirectional GRU + fused final FC ------------------
# Produces fc(gru_out[:, -1]) padded to 128 lanes, where gru_out[:, -1] ==
# concat(forward hidden after T steps, reverse-direction output at the last
# timestep).  The reverse half is exactly ONE reverse-GRU step on x_{T-1}
# starting from h0 = 0 (so W_hh_bwd never contributes).  NOTE: this shortcut is
# only valid for last-timestep pooling; do not reuse for full-sequence outputs.
def _bigru_last_fc_kernel(gx_fwd_ref, gx_bwd_last_ref, whh_ref, bhh_fwd_ref,
                          bhh_bwd_ref, w_fc_ref, b_fc_ref, o_ref,
                          h_fwd, h_bwd, *, T, Tc):
    c = pl.program_id(0)
    nc = pl.num_programs(0)

    @pl.when(c == 0)
    def _init():
        h_fwd[...] = jnp.zeros_like(h_fwd)
        gx = gx_bwd_last_ref[...]            # (B, 3H)
        bhh = bhh_bwd_ref[...]               # (1, 3H)
        r = jax.nn.sigmoid(gx[:, :H] + bhh[:, :H])
        z = jax.nn.sigmoid(gx[:, H:2 * H] + bhh[:, H:2 * H])
        n = jnp.tanh(gx[:, 2 * H:] + r * bhh[:, 2 * H:])
        h_bwd[...] = (1.0 - z) * n

    whh = whh_ref[...]                       # (H, 3H), hoisted out of the loop
    bhh_f = bhh_fwd_ref[...]                 # (1, 3H)
    base_t = c * Tc

    def step(i, h):
        # forward GRU step (PyTorch gate order: r, z, n)
        gx = gx_fwd_ref[i]                   # (B, 3H)
        gh = jnp.dot(h, whh, preferred_element_type=jnp.float32) + bhh_f
        r = jax.nn.sigmoid(gx[:, :H] + gh[:, :H])
        z = jax.nn.sigmoid(gx[:, H:2 * H] + gh[:, H:2 * H])
        n = jnp.tanh(gx[:, 2 * H:] + r * gh[:, 2 * H:])
        h_new = (1.0 - z) * n + z * h
        if T % Tc != 0:                      # mask padded steps of last chunk
            h_new = jnp.where(base_t + i < T, h_new, h)
        return h_new

    h_fwd[...] = jax.lax.fori_loop(0, Tc, step, h_fwd[...], unroll=True)

    @pl.when(c == nc - 1)
    def _finalize():
        # fused Linear(2H, NCLS) with lane-dense padded output
        logits = (jnp.dot(h_fwd[...], w_fc_ref[:H, :],
                          preferred_element_type=jnp.float32)
                  + jnp.dot(h_bwd[...], w_fc_ref[H:, :],
                            preferred_element_type=jnp.float32)
                  + b_fc_ref[...])
        o_ref[...] = logits.astype(o_ref.dtype)


def bigru_last_fc(gx_fwd, gx_bwd_last, whh_fwd_t, bhh_fwd, bhh_bwd,
                  w_fc_pad, b_fc_pad):
    T, B, _ = gx_fwd.shape
    Tc = min(TC_CHUNK, T)
    kernel = functools.partial(_bigru_last_fc_kernel, T=T, Tc=Tc)
    return pl.pallas_call(
        kernel,
        out_shape=jax.ShapeDtypeStruct((B, NCLS_PAD), jnp.float32),
        grid_spec=pltpu.PrefetchScalarGridSpec(
            num_scalar_prefetch=0,
            grid=(pl.cdiv(T, Tc),),
            in_specs=[pl.BlockSpec((Tc, B, G), lambda c: (c, 0, 0)),
                      pl.BlockSpec((B, G), lambda c: (0, 0)),
                      pl.BlockSpec((H, G), lambda c: (0, 0)),
                      pl.BlockSpec((1, G), lambda c: (0, 0)),
                      pl.BlockSpec((1, G), lambda c: (0, 0)),
                      pl.BlockSpec((2 * H, NCLS_PAD), lambda c: (0, 0)),
                      pl.BlockSpec((1, NCLS_PAD), lambda c: (0, 0))],
            out_specs=pl.BlockSpec((B, NCLS_PAD), lambda c: (0, 0)),
            scratch_shapes=[pltpu.VMEM((B, H), jnp.float32),
                            pltpu.VMEM((B, H), jnp.float32)]),
        compiler_params=pltpu.CompilerParams(
            dimension_semantics=("arbitrary",)),
    )(gx_fwd, gx_bwd_last, whh_fwd_t, bhh_fwd.reshape(1, G),
      bhh_bwd.reshape(1, G), w_fc_pad, b_fc_pad.reshape(1, NCLS_PAD))


# ----------------------------------- model -----------------------------------
def init_params(key):
    ks = jax.random.split(key, 10)
    s = 1.0 / float(np.sqrt(H))
    u = lambda k, shape: jax.random.uniform(k, shape, jnp.float32, -s, s)
    return {
        # synthetic per-step feature table (stand-in for pretrained encoders)
        "emb": jax.random.normal(ks[0], (VOCAB, E), jnp.float32) * 0.5,
        # GRU forward direction
        "w_ih_fwd_t": u(ks[1], (E, G)),
        "w_hh_fwd_t": u(ks[2], (H, G)),
        "b_ih_fwd": u(ks[3], (G,)),
        "b_hh_fwd": u(ks[4], (G,)),
        # GRU reverse direction (w_hh_bwd never contributes to output[:, -1])
        "w_ih_bwd_t": u(ks[5], (E, G)),
        "b_ih_bwd": u(ks[6], (G,)),
        "b_hh_bwd": u(ks[7], (G,)),
        # fc: Linear(2H, 2)
        "w_fc_t": u(ks[8], (2 * H, NCLS)),
        "b_fc": u(ks[9], (NCLS,)),
    }


def text_splice_gru_forward(params, txt):
    B, T = txt.shape
    # TODO(synk): the pretrained ResNet50 / RoBERTa per-step encoders of
    # Fusion_Basic have no self-contained Pallas equivalent; a synthetic
    # embedding lookup stands in for the per-step feature encoder.
    # Time-major gather -> (T, B, E): the projection output is then already
    # time-major, so no HBM round-trip transpose of the gates is needed.
    x_tm = jnp.take(params["emb"], txt.T, axis=0)                     # (T, B, E)
    x_flat = x_tm.reshape(T * B, E).astype(jnp.bfloat16)
    x_last = x_tm[T - 1].astype(jnp.bfloat16)                         # (B, E)

    # Forward-direction input gates for all timesteps (bf16 MXU, f32 accum).
    gx_fwd = matmul_bias(x_flat,
                         params["w_ih_fwd_t"].astype(jnp.bfloat16),
                         params["b_ih_fwd"]).reshape(T, B, G)

    # Reverse-direction input gates only for the last timestep (the only ones
    # consumed by gru_out[:, -1]).
    gx_bwd_last = matmul_bias(x_last,
                              params["w_ih_bwd_t"].astype(jnp.bfloat16),
                              params["b_ih_bwd"])                     # (B, 3H)

    # FC weight/bias padded to a lane-dense 128-wide output; sliced below.
    w_fc_pad = jnp.zeros((2 * H, NCLS_PAD), jnp.float32).at[:, :NCLS].set(
        params["w_fc_t"])
    b_fc_pad = jnp.zeros((NCLS_PAD,), jnp.float32).at[:NCLS].set(params["b_fc"])

    out_pad = bigru_last_fc(gx_fwd, gx_bwd_last, params["w_hh_fwd_t"],
                            params["b_hh_fwd"], params["b_hh_bwd"],
                            w_fc_pad, b_fc_pad)                       # (B, 128)
    return out_pad[:, :NCLS]


# --------------------------- pure-JAX reference check ---------------------------
def reference_forward(params, txt):
    x = jnp.take(params["emb"], txt, axis=0)                          # (B, T, E)
    B, T, _ = x.shape

    def step_fwd(h, xt):
        gx = xt @ params["w_ih_fwd_t"] + params["b_ih_fwd"]
        gh = h @ params["w_hh_fwd_t"] + params["b_hh_fwd"]
        r = jax.nn.sigmoid(gx[:, :H] + gh[:, :H])
        z = jax.nn.sigmoid(gx[:, H:2 * H] + gh[:, H:2 * H])
        n = jnp.tanh(gx[:, 2 * H:] + r * gh[:, 2 * H:])
        return (1.0 - z) * n + z * h, None

    h_fwd, _ = jax.lax.scan(step_fwd, jnp.zeros((B, H), jnp.float32),
                            jnp.transpose(x, (1, 0, 2)))

    xt = x[:, -1]
    gx = xt @ params["w_ih_bwd_t"] + params["b_ih_bwd"]
    gh = params["b_hh_bwd"]
    r = jax.nn.sigmoid(gx[:, :H] + gh[:H])
    z = jax.nn.sigmoid(gx[:, H:2 * H] + gh[H:2 * H])
    n = jnp.tanh(gx[:, 2 * H:] + r * gh[2 * H:])
    h_bwd = (1.0 - z) * n

    out = jnp.concatenate([h_fwd, h_bwd], axis=-1)
    return out @ params["w_fc_t"] + params["b_fc"]


if __name__ == "__main__":
    key = jax.random.PRNGKey(0)
    pkey, tkey = jax.random.split(key)
    params = init_params(pkey)

    B, T = 2, 8
    txt = jax.random.randint(tkey, (B, T), 0, VOCAB, dtype=jnp.int32)

    out = text_splice_gru_forward(params, txt)
    out = jax.block_until_ready(out)
    assert out.shape == (B, NCLS)

    ref = reference_forward(params, txt)
    np.testing.assert_allclose(np.asarray(out), np.asarray(ref),
                               atol=2e-2, rtol=2e-2)

    print("KERNEL_OK")
</pallas_src>

<mosaic_0001>
module attributes {stable_mosaic.version = 11 : i64} {
  func.func @_matmul_bias_kernel(%arg0: i32, %arg1: memref<16x768xbf16, #tpu.memory_space<vmem>>, %arg2: memref<768x384xbf16, #tpu.memory_space<vmem>>, %arg3: memref<1x384xf32, #tpu.memory_space<vmem>>, %arg4: memref<16x384xf32, #tpu.memory_space<vmem>>) attributes {dimension_semantics = [#tpu.dimension_semantics<parallel>], iteration_bounds = array<i64: 1>, scalar_prefetch = 0 : i64, scratch_operands = 0 : i64, tpu.core_type = #tpu.core_type<tc>, window_params = [{transform_indices = @transform_0, window_bounds = array<i64: 16, 768>}, {pipeline_mode = #tpu.pipeline_mode<synchronous>, transform_indices = @transform_1, window_bounds = array<i64: 768, 384>}, {pipeline_mode = #tpu.pipeline_mode<synchronous>, transform_indices = @transform_2, window_bounds = array<i64: 1, 384>}, {transform_indices = @transform_3, window_bounds = array<i64: 16, 384>}]} {
    %c0 = arith.constant 0 : index
    %c0_0 = arith.constant 0 : index
    %0 = vector.load %arg1[%c0, %c0_0] : memref<16x768xbf16, #tpu.memory_space<vmem>>, vector<16x768xbf16>
    %c0_1 = arith.constant 0 : index
    %c0_2 = arith.constant 0 : index
    %1 = vector.load %arg2[%c0_1, %c0_2] : memref<768x384xbf16, #tpu.memory_space<vmem>>, vector<768x384xbf16>
    %cst = arith.constant dense<0.000000e+00> : vector<16x384xf32>
    %2 = tpu.matmul %0, %1, %cst {dimension_numbers = #tpu.dot_dimension_numbers<[1], [0], [0], [1], [0, 0, 1, 1], [], []>} : vector<16x768xbf16>, vector<768x384xbf16>, vector<16x384xf32> -> vector<16x384xf32>
    %c0_3 = arith.constant 0 : index
    %c0_4 = arith.constant 0 : index
    %3 = vector.load %arg3[%c0_3, %c0_4] : memref<1x384xf32, #tpu.memory_space<vmem>>, vector<1x384xf32>
    %4 = vector.broadcast %3 : vector<1x384xf32> to vector<16x384xf32>
    %5 = arith.addf %2, %4 : vector<16x384xf32>
    %c0_5 = arith.constant 0 : index
    %c0_6 = arith.constant 0 : index
    %6 = vector.load %arg4[%c0_5, %c0_6] : memref<16x384xf32, #tpu.memory_space<vmem>>, vector<16x384xf32>
    tpu.vector_store %arg4[%c0_5, %c0_6], %5 {strides = array<i32>} : memref<16x384xf32, #tpu.memory_space<vmem>>, vector<16x384xf32>,
    return
  }
  func.func @transform_0(%arg0: i32) -> (i32, i32) {
    %c0_i32 = arith.constant 0 : i32
    %c0_i32_0 = arith.constant 0 : i32
    return %arg0, %c0_i32 : i32, i32
  }
  func.func @transform_1(%arg0: i32) -> (i32, i32) {
    %c0_i32 = arith.constant 0 : i32
    %c0_i32_0 = arith.constant 0 : i32
    %c0_i32_1 = arith.constant 0 : i32
    return %c0_i32, %c0_i32_0 : i32, i32
  }
  func.func @transform_2(%arg0: i32) -> (i32, i32) {
    %c0_i32 = arith.constant 0 : i32
    %c0_i32_0 = arith.constant 0 : i32
    %c0_i32_1 = arith.constant 0 : i32
    return %c0_i32, %c0_i32_0 : i32, i32
  }
  func.func @transform_3(%arg0: i32) -> (i32, i32) {
    %c0_i32 = arith.constant 0 : i32
    %c0_i32_0 = arith.constant 0 : i32
    return %arg0, %c0_i32 : i32, i32
  }
}

</mosaic_0001>

<bundles_post_ra>
// kernel: tpu_custom_call.1
= control target key start
LH: loop header
LB: loop body
LE: loop exit
PB: predicated region body
PF: predicated region fallthrough
CT: control target
= control target key end

     0   :  { %8 = vsyncpa [#allocation3], 0  ;;  %s1884_s0 = inlined_call_operand.hbm [shape: bf16[16,768], index: 0, kind: input, shape index: {}]   ;;  %s1885_s1 = inlined_call_operand.hbm [shape: bf16[768,384], index: 1, kind: input, shape index: {}]   ;;  %s1886_s2 = inlined_call_operand.vmem [shape: f32[1,384], index: 2, kind: input, shape index: {}]   ;;  %s1887_s3 = inlined_call_operand.hbm [shape: f32[16,384], index: 3, kind: output, shape index: {}]  }
   0x1   :  { %9 = vsyncpa [#allocation6], 0 }
   0x2   :  { %10 = vsyncpa [#allocation4], 0  ;;  %s1823_s12 = smov [#allocation2]  }
   0x3   :  { %s16_s13 = sshll.u32 %s1823_s12, 4  ;;  %s17_s13 = int_to_ptr.vmem [resolvable:$true] %s16_s13 }
   0x4   :  { %s1765_s14 = scalar_lea.vmem %s17_s13, 768  ;;  %p1770_p1 = scmp.lt.s32.totalorder %s17_s13, %s17_s13 }
   0x5   :  { %p1766_p0 = scmp.ne.s32.totalorder %s17_s13, %s1765_s14  ;;  %p1771_p2 = scmp.lt.s32.totalorder %s1765_s14, %s1765_s14 }
   0x7   :  { %p1772_p3 = por %p1771_p2, %p1770_p1 }
   0x9   :  { %p1773_p4 = pnand %p1772_p3, %p1766_p0 }
   0xb   :  { %1776 = shalt.err (!%p1773_p4)
}
   0xc   :  { %s1824_s15 = smov 384   ;;  %s1825_s16 = smov 24  }
   0xd   :  { %22 = dma.hbm_to_vmem [thread:$0]  %s1884_s0, 768, %s17_s13, [#allocation3], %s1824_s15, %s1824_s15, %s1825_s16  }
   0xe   :  { %s1826_s19 = smov [#allocation5]  }
   0xf   :  { %s28_s20 = sshll.u32 %s1826_s19, 4  ;;  %s29_s20 = int_to_ptr.vmem [resolvable:$true] %s28_s20 }
  0x10   :  { %s1785_s21 = scalar_lea.vmem %s29_s20, 18432  ;;  %p1790_p6 = scmp.lt.s32.totalorder %s29_s20, %s29_s20 }
  0x11   :  { %p1786_p5 = scmp.ne.s32.totalorder %s29_s20, %s1785_s21  ;;  %p1791_p7 = scmp.lt.s32.totalorder %s1785_s21, %s1785_s21 }
  0x13   :  { %p1792_p8 = por %p1791_p7, %p1790_p6 }
  0x15   :  { %p1793_p9 = pnand %p1792_p8, %p1786_p5 }
  0x17   :  { %1796 = shalt.err (!%p1793_p9)
}
  0x18   :  { %s1827_s22 = smov 192   ;;  %s1828_s23 = smov 12  }
  0x19   :  { %34 = dma.hbm_to_vmem [thread:$0]  %s1885_s1, 18432, %s29_s20, [#allocation6], %s1827_s22, %s1827_s22, %s1828_s23  }
  0x1a   :  { %1817 = dma.done.wait [#allocation3], 768  }
  0x1b   :  { %1818 = vsyncadd [#allocation3], 4294966528 }
  0x1c   :  { %1819 = dma.done.wait [#allocation6], 18432  }
  0x1d   :  { %1820 = vsyncadd [#allocation6], 4294948864  ;;  %v1556_v0 = vld [vmem:[#allocation5 + $0xac] ss:$12 sps:$4 sm:$0xff]   ;;  %v1560_v2 = vld [vmem:[#allocation5 + $0xa8] ss:$12 sps:$4 sm:$0xff]  }
  0x1e   :  { %v1558_v1 = vld [vmem:[#allocation5 + $0x22c] ss:$12 sps:$4 sm:$0xff]   ;;  %1057 = vmatprep.subr.bf16.mxu0 %v1556_v0  ;;  %v1561_v3 = vld [vmem:[#allocation5 + $0x228] ss:$12 sps:$4 sm:$0xff]   ;;  %v1566_v6 = vld [vmem:[#allocation5 + $0x90] ss:$12 sps:$4 sm:$0xff]  }
  0x1f   :  { %1100 = vmatprep.subr.bf16.mxu1 %v1558_v1  ;;  %v1562_v4 = vld [vmem:[#allocation5 + $0x94] ss:$12 sps:$4 sm:$0xff]   ;;  %1058 = vmatpush1.bf16.msra.mxu0 %v1560_v2  ;;  %v1567_v7 = vld [vmem:[#allocation5 + $0x210] ss:$12 sps:$4 sm:$0xff]   ;;  %v1572_v10 = vld [vmem:[#allocation5 + $0x78] ss:$12 sps:$4 sm:$0xff]  }
  0x20   :  { %1101 = vmatpush1.bf16.msra.mxu1 %v1561_v3  ;;  %v1564_v5 = vld [vmem:[#allocation5 + $0x214] ss:$12 sps:$4 sm:$0xff]   ;;  %1059 = vmatprep.subr.bf16.mxu0 %v1562_v4  ;;  %v1568_v8 = vld [vmem:[#allocation5 + $0x7c] ss:$12 sps:$4 sm:$0xff]   ;;  %v1573_v11 = vld [vmem:[#allocation5 + $0x1f8] ss:$12 sps:$4 sm:$0xff]  }
  0x21   :  { %1102 = vmatprep.subr.bf16.mxu1 %v1564_v5  ;;  %v1570_v9 = vld [vmem:[#allocation5 + $0x1fc] ss:$12 sps:$4 sm:$0xff]   ;;  %v1574_v12 = vld [vmem:[#allocation5 + $0x64] ss:$12 sps:$4 sm:$0xff]   ;;  %v1578_v14 = vld [vmem:[#allocation5 + $0x60] ss:$12 sps:$4 sm:$0xff]  }
  0x22   :  { %v1576_v13 = vld [vmem:[#allocation5 + $0x1e4] ss:$12 sps:$4 sm:$0xff]   ;;  %v1579_v15 = vld [vmem:[#allocation5 + $0x1e0] ss:$12 sps:$4 sm:$0xff]   ;;  %v1584_v18 = vld [vmem:[#allocation5 + $0x48] ss:$12 sps:$4 sm:$0xff]  }
  0x23   :  { %1060 = vmatpush1.bf16.msra.mxu0 %v1566_v6  ;;  %v1580_v16 = vld [vmem:[#allocation5 + $0x4c] ss:$12 sps:$4 sm:$0xff]   ;;  %v1585_v19 = vld [vmem:[#allocation5 + $0x1c8] ss:$12 sps:$4 sm:$0xff]   ;;  %v1590_v22 = vld [vmem:[#allocation5 + $0x30] ss:$12 sps:$4 sm:$0xff]  }
  0x24   :  { %1103 = vmatpush1.bf16.msra.mxu1 %v1567_v7  ;;  %1061 = vmatprep.subr.bf16.mxu0 %v1568_v8  ;;  %v1582_v17 = vld [vmem:[#allocation5 + $0x1cc] ss:$12 sps:$4 sm:$0xff]   ;;  %v1586_v20 = vld [vmem:[#allocation5 + $0x34] ss:$12 sps:$4 sm:$0xff]   ;;  %v1591_v23 = vld [vmem:[#allocation5 + $0x1b0] ss:$12 sps:$4 sm:$0xff]  }
  0x25   :  { %1104 = vmatprep.subr.bf16.mxu1 %v1570_v9  ;;  %v1588_v21 = vld [vmem:[#allocation5 + $0x1b4] ss:$12 sps:$4 sm:$0xff]   ;;  %v1592_v24 = vld [vmem:[#allocation5 + $0x1c] ss:$12 sps:$4 sm:$0xff]   ;;  %v1596_v26 = vld [vmem:[#allocation5 + $0x18] ss:$12 sps:$4 sm:$0xff]  }
  0x26   :  { %v1594_v25 = vld [vmem:[#allocation5 + $0x19c] ss:$12 sps:$4 sm:$0xff]   ;;  %v1597_v27 = vld [vmem:[#allocation5 + $0x198] ss:$12 sps:$4 sm:$0xff]   ;;  %v1602_v30 = vld [vmem:[#allocation5] ss:$12 sps:$4 sm:$0xff]  }
  0x27   :  { %1062 = vmatpush1.bf16.msra.mxu0 %v1572_v10  ;;  %v1598_v28 = vld [vmem:[#allocation5 + $0x4] ss:$12 sps:$4 sm:$0xff]   ;;  %v1603_v31 = vld [vmem:[#allocation5 + $0x180] ss:$12 sps:$4 sm:$0xff]   ;;  %v1608_v34 = vld [vmem:[#allocation5 + $0x168] ss:$12 sps:$4 sm:$0xff]  }
  0x28   :  { %1105 = vmatpush1.bf16.msra.mxu1 %v1573_v11  ;;  %1063 = vmatprep.subr.bf16.mxu0 %v1574_v12  ;;  %v1600_v29 = vld [vmem:[#allocation5 + $0x184] ss:$12 sps:$4 sm:$0xff]   ;;  %v1604_v32 = vld [vmem:[#allocation5 + $0x16c] ss:$12 sps:$4 sm:$0xff]   ;;  %v1609_v35 = vld [vmem:[#allocation5 + $0x2e8] ss:$12 sps:$4 sm:$0xff]  }
  0x29   :  { %1106 = vmatprep.subr.bf16.mxu1 %v1576_v13  ;;  %v1606_v33 = vld [vmem:[#allocation5 + $0x2ec] ss:$12 sps:$4 sm:$0xff]   ;;  %v1610_v36 = vld [vmem:[#allocation5 + $0x154] ss:$12 sps:$4 sm:$0xff]   ;;  %v1614_v38 = vld [vmem:[#allocation5 + $0x150] ss:$12 sps:$4 sm:$0xff]  }
  0x2a   :  { %v1612_v37 = vld [vmem:[#allocation5 + $0x2d4] ss:$12 sps:$4 sm:$0xff]   ;;  %v1615_v39 = vld [vmem:[#allocation5 + $0x2d0] ss:$12 sps:$4 sm:$0xff]   ;;  %v1620_v42 = vld [vmem:[#allocation5 + $0x138] ss:$12 sps:$4 sm:$0xff]  }
  0x2b   :  { %1064 = vmatpush1.bf16.msra.mxu0 %v1578_v14  ;;  %v1616_v40 = vld [vmem:[#allocation5 + $0x13c] ss:$12 sps:$4 sm:$0xff]   ;;  %v1621_v43 = vld [vmem:[#allocation5 + $0x2b8] ss:$12 sps:$4 sm:$0xff]   ;;  %v1626_v46 = vld [vmem:[#allocation5 + $0x120] ss:$12 sps:$4 sm:$0xff]  }
  0x2c   :  { %1107 = vmatpush1.bf16.msra.mxu1 %v1579_v15  ;;  %1065 = vmatprep.subr.bf16.mxu0 %v1580_v16  ;;  %v1618_v41 = vld [vmem:[#allocation5 + $0x2bc] ss:$12 sps:$4 sm:$0xff]   ;;  %v1622_v44 = vld [vmem:[#allocation5 + $0x124] ss:$12 sps:$4 sm:$0xff]   ;;  %v1627_v47 = vld [vmem:[#allocation5 + $0x2a0] ss:$12 sps:$4 sm:$0xff]  }
  0x2d   :  { %1108 = vmatprep.subr.bf16.mxu1 %v1582_v17  ;;  %v1624_v45 = vld [vmem:[#allocation5 + $0x2a4] ss:$12 sps:$4 sm:$0xff]   ;;  %v1628_v48 = vld [vmem:[#allocation5 + $0x10c] ss:$12 sps:$4 sm:$0xff]   ;;  %v1859_v51 = vld [vmem:[#allocation2 + $0xc] ss:$24 sps:$4 sm:$0xff]  }
  0x2e   :  { %v1654_v49 = vld [vmem:[#allocation2 + $0x4] ss:$24 sps:$4 sm:$0xff]   ;;  %1132 = vmatprep.mubr.bf16.mxu1 %v1859_v51  ;;  %v1638_v56 = vld [vmem:[#allocation5 + $0xf0] ss:$12 sps:$4 sm:$0xff]   ;;  %v1644_v60 = vld [vmem:[#allocation5 + $0xd8] ss:$12 sps:$4 sm:$0xff]  }
  0x2f   :  { %1066 = vmatpush1.bf16.msra.mxu0 %v1584_v18  ;;  %v1630_v50 = vld [vmem:[#allocation5 + $0x28c] ss:$12 sps:$4 sm:$0xff]   ;;  %1089 = vmatprep.mubr.bf16.mxu0 %v1654_v49  ;;  %v1632_v52 = vld [vmem:[#allocation5 + $0x108] ss:$12 sps:$4 sm:$0xff]   ;;  %v1639_v57 = vld [vmem:[#allocation5 + $0x270] ss:$12 sps:$4 sm:$0xff]  }
  0x30   :  { %1109 = vmatpush1.bf16.msra.mxu1 %v1585_v19  ;;  %1067 = vmatprep.subr.bf16.mxu0 %v1586_v20  ;;  %v1633_v53 = vld [vmem:[#allocation5 + $0x288] ss:$12 sps:$4 sm:$0xff]   ;;  %v1645_v61 = vld [vmem:[#allocation5 + $0x258] ss:$12 sps:$4 sm:$0xff]   ;;  %v1650_v0 = vld [vmem:[#allocation5 + $0xc0] ss:$12 sps:$4 sm:$0xff]  }
  0x31   :  { %1110 = vmatprep.subr.bf16.mxu1 %v1588_v21  ;;  %v1634_v54 = vld [vmem:[#allocation5 + $0xf4] ss:$12 sps:$4 sm:$0xff]   ;;  %v1640_v58 = vld [vmem:[#allocation5 + $0xdc] ss:$12 sps:$4 sm:$0xff]   ;;  %v1646_v62 = vld [vmem:[#allocation5 + $0xc4] ss:$12 sps:$4 sm:$0xff]  }
  0x32   :  { %v1636_v55 = vld [vmem:[#allocation5 + $0x274] ss:$12 sps:$4 sm:$0xff]   ;;  %v1642_v59 = vld [vmem:[#allocation5 + $0x25c] ss:$12 sps:$4 sm:$0xff]   ;;  %v1648_v63 = vld [vmem:[#allocation5 + $0x244] ss:$12 sps:$4 sm:$0xff]  }
  0x33   :  { %1068 = vmatpush1.bf16.msra.mxu0 %v1590_v22  ;;  %v1651_v1 = vld [vmem:[#allocation5 + $0x240] ss:$12 sps:$4 sm:$0xff]   ;;  %v1862_v3 = vld [vmem:[#allocation2] ss:$24 sps:$4 sm:$0xff]   ;;  %v1666_v9 = vld [vmem:[#allocation5 + $0x158] ss:$12 sps:$4 sm:$0xff]  }
  0x34   :  { %1111 = vmatpush1.bf16.msra.mxu1 %v1591_v23  ;;  %1069 = vmatprep.subr.bf16.mxu0 %v1592_v24  ;;  %v1660_v2 = vld [vmem:[#allocation5 + $0x3ac] ss:$12 sps:$4 sm:$0xff]   ;;  %v1661_v5 = vld [vmem:[#allocation5 + $0x170] ss:$12 sps:$4 sm:$0xff]   ;;  %v1658_v6 = vld [vmem:[#allocation5 + $0x3a8] ss:$12 sps:$4 sm:$0xff]  }
  0x35   :  { %1112 = vmatprep.subr.bf16.mxu1 %v1594_v25  ;;  %v1864_v4 = vld [vmem:[#allocation2 + $0x8] ss:$24 sps:$4 sm:$0xff]   ;;  %v1665_v8 = vld [vmem:[#allocation5 + $0x394] ss:$12 sps:$4 sm:$0xff]   ;;  %v1670_v12 = vld [vmem:[#allocation5 + $0x37c] ss:$12 sps:$4 sm:$0xff]  }
  0x36   :  { %v1662_v7 = vld [vmem:[#allocation5 + $0xb0] ss:$12 sps:$4 sm:$0xff]   ;;  %v1667_v11 = vld [vmem:[#allocation5 + $0x98] ss:$12 sps:$4 sm:$0xff]   ;;  %v1671_v13 = vld [vmem:[#allocation5 + $0x140] ss:$12 sps:$4 sm:$0xff]  }
  0x37   :  { %1070 = vmatpush1.bf16.msra.mxu0 %v1596_v26  ;;  %v1663_v10 = vld [vmem:[#allocation5 + $0x390] ss:$12 sps:$4 sm:$0xff]   ;;  %v1668_v14 = vld [vmem:[#allocation5 + $0x378] ss:$12 sps:$4 sm:$0xff]   ;;  %v1672_v15 = vld [vmem:[#allocation5 + $0x80] ss:$12 sps:$4 sm:$0xff]  }
  0x38   :  { %1113 = vmatpush1.bf16.msra.mxu1 %v1597_v27  ;;  %1071 = vmatprep.subr.bf16.mxu0 %v1598_v28  ;;  %v1675_v16 = vld [vmem:[#allocation5 + $0x364] ss:$12 sps:$4 sm:$0xff]   ;;  %v1676_v17 = vld [vmem:[#allocation5 + $0x128] ss:$12 sps:$4 sm:$0xff]   ;;  %v1673_v18 = vld [vmem:[#allocation5 + $0x360] ss:$12 sps:$4 sm:$0xff]  }
  0x39   :  { %1114 = vmatprep.subr.bf16.mxu1 %v1600_v29  ;;  %v1677_v19 = vld [vmem:[#allocation5 + $0x68] ss:$12 sps:$4 sm:$0xff]   ;;  %v1680_v20 = vld [vmem:[#allocation5 + $0x34c] ss:$12 sps:$4 sm:$0xff]   ;;  %v1681_v21 = vld [vmem:[#allocation5 + $0x110] ss:$12 sps:$4 sm:$0xff]  }
  0x3a   :  { %v1678_v22 = vld [vmem:[#allocation5 + $0x348] ss:$12 sps:$4 sm:$0xff]   ;;  %v1682_v23 = vld [vmem:[#allocation5 + $0x50] ss:$12 sps:$4 sm:$0xff]   ;;  %v1686_v25 = vld [vmem:[#allocation5 + $0xf8] ss:$12 sps:$4 sm:$0xff]  }
  0x3b   :  { %1072 = vmatpush1.bf16.msra.mxu0 %v1602_v30  ;;  %v1685_v24 = vld [vmem:[#allocation5 + $0x334] ss:$12 sps:$4 sm:$0xff]   ;;  %v1683_v26 = vld [vmem:[#allocation5 + $0x330] ss:$12 sps:$4 sm:$0xff]   ;;  %v1687_v27 = vld [vmem:[#allocation5 + $0x38] ss:$12 sps:$4 sm:$0xff]  }
  0x3c   :  { %1115 = vmatpush1.bf16.msra.mxu1 %v1603_v31  ;;  %1073 = vmatprep.subr.bf16.mxu0 %v1604_v32  ;;  %v1690_v28 = vld [vmem:[#allocation5 + $0x31c] ss:$12 sps:$4 sm:$0xff]   ;;  %v1691_v29 = vld [vmem:[#allocation5 + $0xe0] ss:$12 sps:$4 sm:$0xff]   ;;  %v1688_v30 = vld [vmem:[#allocation5 + $0x318] ss:$12 sps:$4 sm:$0xff]  }
  0x3d   :  { %1116 = vmatprep.subr.bf16.mxu1 %v1606_v33  ;;  %v1692_v31 = vld [vmem:[#allocation5 + $0x20] ss:$12 sps:$4 sm:$0xff]   ;;  %v1695_v32 = vld [vmem:[#allocation5 + $0x304] ss:$12 sps:$4 sm:$0xff]   ;;  %v1696_v33 = vld [vmem:[#allocation5 + $0xc8] ss:$12 sps:$4 sm:$0xff]  }
  0x3f   :  { %1074 = vmatpush2.bf16.msra.mxu0 %v1608_v34  ;;  %v1693_v34 = vld [vmem:[#allocation5 + $0x300] ss:$12 sps:$4 sm:$0xff]  }
  0x40   :  { %1117 = vmatpush2.bf16.msra.mxu1 %v1609_v35  ;;  %1075 = vmatprep.subr.bf16.mxu0 %v1610_v36  ;;  %v1697_v35 = vld [vmem:[#allocation5 + $0x8] ss:$12 sps:$4 sm:$0xff]   ;;  %v1700_v36 = vld [vmem:[#allocation5 + $0x46c] ss:$12 sps:$4 sm:$0xff]  }
  0x41   :  { %1118 = vmatprep.subr.bf16.mxu1 %v1612_v37  ;;  %v1701_v37 = vld [vmem:[#allocation5 + $0x2f0] ss:$12 sps:$4 sm:$0xff]  }
  0x43   :  { %1076 = vmatpush2.bf16.msra.mxu0 %v1614_v38  ;;  %v1698_v38 = vld [vmem:[#allocation5 + $0x468] ss:$12 sps:$4 sm:$0xff]  }
  0x44   :  { %1119 = vmatpush2.bf16.msra.mxu1 %v1615_v39  ;;  %1077 = vmatprep.subr.bf16.mxu0 %v1616_v40  ;;  %v1702_v39 = vld [vmem:[#allocation5 + $0x230] ss:$12 sps:$4 sm:$0xff]   ;;  %v1705_v40 = vld [vmem:[#allocation5 + $0x454] ss:$12 sps:$4 sm:$0xff]  }
  0x45   :  { %1120 = vmatprep.subr.bf16.mxu1 %v1618_v41  ;;  %v1706_v41 = vld [vmem:[#allocation5 + $0x2d8] ss:$12 sps:$4 sm:$0xff]  }
  0x47   :  { %1078 = vmatpush2.bf16.msra.mxu0 %v1620_v42  ;;  %v1703_v42 = vld [vmem:[#allocation5 + $0x450] ss:$12 sps:$4 sm:$0xff]  }
  0x48   :  { %1121 = vmatpush2.bf16.msra.mxu1 %v1621_v43  ;;  %1079 = vmatprep.subr.bf16.mxu0 %v1622_v44  ;;  %v1707_v43 = vld [vmem:[#allocation5 + $0x218] ss:$12 sps:$4 sm:$0xff]  }
  0x49   :  { %1122 = vmatprep.subr.bf16.mxu1 %v1624_v45  ;;  %v1869_v44 = vld [vmem:[#allocation2 + $0x14] ss:$24 sps:$4 sm:$0xff]  }
  0x4a   :  { %v1710_v45 = vld [vmem:[#allocation5 + $0x43c] ss:$12 sps:$4 sm:$0xff]  }
  0x4b   :  { %1080 = vmatpush2.bf16.msra.mxu0 %v1626_v46  ;;  %v1711_v46 = vld [vmem:[#allocation5 + $0x2c0] ss:$12 sps:$4 sm:$0xff]  }
  0x4c   :  { %1123 = vmatpush2.bf16.msra.mxu1 %v1627_v47  ;;  %1081 = vmatprep.subr.bf16.mxu0 %v1628_v48  ;;  %v1708_v47 = vld [vmem:[#allocation5 + $0x438] ss:$12 sps:$4 sm:$0xff]   ;;  %v1712_v48 = vld [vmem:[#allocation5 + $0x200] ss:$12 sps:$4 sm:$0xff]  }
  0x4d   :  { %1124 = vmatprep.subr.bf16.mxu1 %v1630_v50  ;;  %v1716_v50 = vld [vmem:[#allocation5 + $0x2a8] ss:$12 sps:$4 sm:$0xff]  }
  0x4f   :  { %1082 = vmatpush2.bf16.msra.mxu0 %v1632_v52  ;;  %v1713_v52 = vld [vmem:[#allocation5 + $0x420] ss:$12 sps:$4 sm:$0xff]  }
  0x50   :  { %1125 = vmatpush2.bf16.msra.mxu1 %v1633_v53  ;;  %1083 = vmatprep.subr.bf16.mxu0 %v1634_v54  ;;  %v1717_v53 = vld [vmem:[#allocation5 + $0x1e8] ss:$12 sps:$4 sm:$0xff]   ;;  %v1720_v54 = vld [vmem:[#allocation5 + $0x40c] ss:$12 sps:$4 sm:$0xff]  }
  0x51   :  { %1126 = vmatprep.subr.bf16.mxu1 %v1636_v55  ;;  %v1721_v55 = vld [vmem:[#allocation5 + $0x290] ss:$12 sps:$4 sm:$0xff]  }
  0x53   :  { %1084 = vmatpush2.bf16.msra.mxu0 %v1638_v56  ;;  %v1718_v56 = vld [vmem:[#allocation5 + $0x408] ss:$12 sps:$4 sm:$0xff]  }
  0x54   :  { %1127 = vmatpush2.bf16.msra.mxu1 %v1639_v57  ;;  %1085 = vmatprep.subr.bf16.mxu0 %v1640_v58  ;;  %v1722_v57 = vld [vmem:[#allocation5 + $0x1d0] ss:$12 sps:$4 sm:$0xff]   ;;  %v1726_v58 = vld [vmem:[#allocation5 + $0x278] ss:$12 sps:$4 sm:$0xff]  }
  0x55   :  { %1128 = vmatprep.subr.bf16.mxu1 %v1642_v59  ;;  %v1723_v59 = vld [vmem:[#allocation5 + $0x3f0] ss:$12 sps:$4 sm:$0xff]  }
  0x57   :  { %1086 = vmatpush2.bf16.msra.mxu0 %v1644_v60  ;;  %v1727_v60 = vld [vmem:[#allocation5 + $0x1b8] ss:$12 sps:$4 sm:$0xff]  }
  0x58   :  { %1129 = vmatpush2.bf16.msra.mxu1 %v1645_v61  ;;  %1087 = vmatprep.subr.bf16.mxu0 %v1646_v62  ;;  %v1730_v61 = vld [vmem:[#allocation5 + $0x3dc] ss:$12 sps:$4 sm:$0xff]   ;;  %v1731_v62 = vld [vmem:[#allocation5 + $0x260] ss:$12 sps:$4 sm:$0xff]  }
  0x59   :  { %1130 = vmatprep.subr.bf16.mxu1 %v1648_v63  ;;  %v1728_v63 = vld [vmem:[#allocation5 + $0x3d8] ss:$12 sps:$4 sm:$0xff]  }
  0x5b   :  { %1088 = vmatpush2.bf16.msra.mxu0 %v1650_v0  ;;  %v1732_v0 = vld [vmem:[#allocation5 + $0x1a0] ss:$12 sps:$4 sm:$0xff]  }
  0x5c   :  { %1131 = vmatpush2.bf16.msra.mxu1 %v1651_v1  ;;  %1143 = vmatprep.subr.bf16.mxu0 %v1660_v2  ;;  %v1735_v1 = vld [vmem:[#allocation5 + $0x3c4] ss:$12 sps:$4 sm:$0xff]   ;;  %v1736_v2 = vld [vmem:[#allocation5 + $0x248] ss:$12 sps:$4 sm:$0xff]  }
  0x5d   :  { %1483 = vmatprep.subr.bf16.mxu1 %v1661_v5  ;;  %v1737_v5 = vld [vmem:[#allocation5 + $0x188] ss:$12 sps:$4 sm:$0xff]  }
  0x5e   :  { %1090 = vmatmul.mubr.bf16.vlgmr.msra.gmra.mxu0 %v1862_v3 }
  0x5f   :  { %1133 = vmatmul.mubr.bf16.vlgmr.msra.gmra.mxu1 %v1864_v4  ;;  %1144 = vmatpush1.bf16.msra.mxu0 %v1658_v6  ;;  %v1741_v6 = vld [vmem:[#allocation5 + $0x470] ss:$12 sps:$4 sm:$0xff]  }
  0x60   :  { %1484 = vmatpush3.bf16.msra.mxu1 %v1662_v7  ;;  %1145 = vmatprep.subr.bf16.mxu0 %v1665_v8  ;;  %v1738_v7 = vld [vmem:[#allocation2 + $0x10] ss:$24 sps:$4 sm:$0xff]   ;;  %v1742_v8 = vld [vmem:[#allocation5 + $0x3b0] ss:$12 sps:$4 sm:$0xff]  }
  0x61   :  { %1485 = vmatprep.subr.bf16.mxu1 %v1666_v9  ;;  %1218 = vmatprep.mubr.bf16.mxu1 %v1654_v49  ;;  %v1715_v49 = vld [vmem:[#allocation5 + $0x424] ss:$12 sps:$4 sm:$0xff]  }
  0x62   :  { %1175 = vmatprep.mubr.bf16.mxu0 %v1869_v44  ;;  %v1743_v9 = vld [vmem:[#allocation5 + $0x458] ss:$12 sps:$4 sm:$0xff]  }
  0x63   :  { %1146 = vmatpush1.bf16.msra.mxu0 %v1663_v10  ;;  %v1744_v10 = vld [vmem:[#allocation5 + $0x398] ss:$12 sps:$4 sm:$0xff]  }
  0x64   :  { %1486 = vmatpush3.bf16.msra.mxu1 %v1667_v11  ;;  %1147 = vmatprep.subr.bf16.mxu0 %v1670_v12  ;;  %v1745_v11 = vld [vmem:[#allocation5 + $0x440] ss:$12 sps:$4 sm:$0xff]  }
  0x65   :  { %1487 = vmatprep.subr.bf16.mxu1 %v1671_v13  ;;  %v1746_v12 = vld [vmem:[#allocation5 + $0x380] ss:$12 sps:$4 sm:$0xff]   ;;  %v1747_v13 = vld [vmem:[#allocation5 + $0x428] ss:$12 sps:$4 sm:$0xff]  }
  0x67   :  { %1148 = vmatpush1.bf16.msra.mxu0 %v1668_v14  ;;  %v1748_v14 = vld [vmem:[#allocation5 + $0x368] ss:$12 sps:$4 sm:$0xff]  }
  0x68   :  { %1488 = vmatpush3.bf16.msra.mxu1 %v1672_v15  ;;  %1149 = vmatprep.subr.bf16.mxu0 %v1675_v16  ;;  %v1749_v15 = vld [vmem:[#allocation5 + $0x410] ss:$12 sps:$4 sm:$0xff]  }
  0x69   :  { %1489 = vmatprep.subr.bf16.mxu1 %v1676_v17  ;;  %v1750_v16 = vld [vmem:[#allocation5 + $0x350] ss:$12 sps:$4 sm:$0xff]   ;;  %v1751_v17 = vld [vmem:[#allocation5 + $0x3f8] ss:$12 sps:$4 sm:$0xff]  }
  0x6b   :  { %1150 = vmatpush1.bf16.msra.mxu0 %v1673_v18  ;;  %v1753_v18 = vld [vmem:[#allocation5 + $0x3e0] ss:$12 sps:$4 sm:$0xff]  }
  0x6c   :  { %1490 = vmatpush3.bf16.msra.mxu1 %v1677_v19  ;;  %1151 = vmatprep.subr.bf16.mxu0 %v1680_v20  ;;  %v1754_v19 = vld [vmem:[#allocation5 + $0x320] ss:$12 sps:$4 sm:$0xff]   ;;  %v1755_v20 = vld [vmem:[#allocation5 + $0x3c8] ss:$12 sps:$4 sm:$0xff]  }
  0x6d   :  { %1491 = vmatprep.subr.bf16.mxu1 %v1681_v21  ;;  %v1756_v21 = vld [vmem:[#allocation5 + $0x308] ss:$12 sps:$4 sm:$0xff]  }
  0x6f   :  { %1152 = vmatpush1.bf16.msra.mxu0 %v1678_v22  ;;  %v244_v22 = vlaneseq }
  0x70   :  { %1492 = vmatpush3.bf16.msra.mxu1 %v1682_v23  ;;  %1153 = vmatprep.subr.bf16.mxu0 %v1685_v24 }
  0x71   :  { %1493 = vmatprep.subr.bf16.mxu1 %v1686_v25  ;;  %v245_v23 = vshrl.u32 %v244_v22, 7 }
  0x73   :  { %1154 = vmatpush1.bf16.msra.mxu0 %v1683_v26  ;;  %v246_v25 = vsub.s32 0, %v245_v23  ;;  %v242_v26 = vld [vmem:[%s1886_s2] sm:$0x7]  ;;  %s1829_s2 = smov [#allocation7]  }
  0x74   :  { %1494 = vmatpush3.bf16.msra.mxu1 %v1687_v27  ;;  %1155 = vmatprep.subr.bf16.mxu0 %v1690_v28  ;;  %v250_v27 = vsub.s32 1, %v245_v23  ;;  %s1320_s26 = sshll.u32 %s1829_s2, 4  ;;  %s1321_s26 = int_to_ptr.vmem [resolvable:$true] %s1320_s26 }
  0x75   :  { %1495 = vmatprep.subr.bf16.mxu1 %v1691_v29  ;;  %s1797_s27 = scalar_lea.vmem %s1321_s26, 768  ;;  %p1802_p11 = scmp.lt.s32.totalorder %s1321_s26, %s1321_s26 }
  0x76   :  { %p1798_p10 = scmp.ne.s32.totalorder %s1321_s26, %s1797_s27  ;;  %p1803_p12 = scmp.lt.s32.totalorder %s1797_s27, %s1797_s27 }
  0x77   :  { %1156 = vmatpush1.bf16.msra.mxu0 %v1688_v30  ;;  %v247_v30 = vrot.slane %v242_v26, %v246_v25 }
  0x78   :  { %1496 = vmatpush3.bf16.msra.mxu1 %v1692_v31  ;;  %1157 = vmatprep.subr.bf16.mxu0 %v1695_v32  ;;  %v251_v31 = vrot.slane %v242_v26, %v250_v27  ;;  %p1804_p13 = por %p1803_p12, %p1802_p11 }
  0x79   :  { %1497 = vmatprep.subr.bf16.mxu1 %v1696_v33 }
  0x7a   :  { %p1805_p0 = pnand %p1804_p13, %p1798_p10 }
  0x7b   :  { %1158 = vmatpush1.bf16.msra.mxu0 %v1693_v34 }
  0x7c   :  { %1498 = vmatpush3.bf16.msra.mxu1 %v1697_v35  ;;  %1159 = vmatprep.subr.bf16.mxu0 %v1700_v36 }
  0x7d   :  { %1505 = vmatprep.subr.bf16.mxu1 %v1701_v37 }
  0x7f   :  { %1219 = vmatmul.mubr.bf16.vlgmr.msra.gmra.mxu1 %v1862_v3  ;;  %1160 = vmatpush2.bf16.msra.mxu0 %v1698_v38  ;;  %v1733_v3 = vld [vmem:[#allocation5 + $0x3c0] ss:$12 sps:$4 sm:$0xff]  }
  0x80   :  { %1506 = vmatpush3.bf16.msra.mxu1 %v1702_v39  ;;  %1161 = vmatprep.subr.bf16.mxu0 %v1705_v40 }
  0x81   :  { %1507 = vmatprep.subr.bf16.mxu1 %v1706_v41  ;;  %1259 = vmatprep.mubr.bf16.mxu1 %v1859_v51  ;;  %v1725_v51 = vld [vmem:[#allocation5 + $0x3f4] ss:$12 sps:$4 sm:$0xff]  }
  0x83   :  { %1162 = vmatpush2.bf16.msra.mxu0 %v1703_v42 }
  0x84   :  { %1508 = vmatpush3.bf16.msra.mxu1 %v1707_v43  ;;  %1163 = vmatprep.subr.bf16.mxu0 %v1710_v45 }
  0x85   :  { %1509 = vmatprep.subr.bf16.mxu1 %v1711_v46 }
  0x87   :  { %1164 = vmatpush2.bf16.msra.mxu0 %v1708_v47 }
  0x88   :  { %1510 = vmatpush3.bf16.msra.mxu1 %v1712_v48  ;;  %1165 = vmatprep.subr.bf16.mxu0 %v1715_v49 }
  0x89   :  { %1511 = vmatprep.subr.bf16.mxu1 %v1716_v50 }
  0x8b   :  { %1166 = vmatpush2.bf16.msra.mxu0 %v1713_v52 }
  0x8c   :  { %1512 = vmatpush3.bf16.msra.mxu1 %v1717_v53  ;;  %1167 = vmatprep.subr.bf16.mxu0 %v1720_v54 }
  0x8d   :  { %1513 = vmatprep.subr.bf16.mxu1 %v1721_v55 }
  0x8f   :  { %1168 = vmatpush2.bf16.msra.mxu0 %v1718_v56 }
  0x90   :  { %1514 = vmatpush3.bf16.msra.mxu1 %v1722_v57  ;;  %1169 = vmatprep.subr.bf16.mxu0 %v1725_v51 }
  0x91   :  { %1515 = vmatprep.subr.bf16.mxu1 %v1726_v58  ;;  %v254_v58 = vsub.s32 2, %v245_v23 }
  0x93   :  { %1170 = vmatpush2.bf16.msra.mxu0 %v1723_v59 }
  0x94   :  { %1516 = vmatpush3.bf16.msra.mxu1 %v1727_v60  ;;  %1171 = vmatprep.subr.bf16.mxu0 %v1730_v61  ;;  %v255_v60 = vrot.slane %v242_v26, %v254_v58 }
  0x95   :  { %1517 = vmatprep.subr.bf16.mxu1 %v1731_v62 }
  0x97   :  { %1172 = vmatpush2.bf16.msra.mxu0 %v1728_v63 }
  0x98   :  { %1518 = vmatpush3.bf16.msra.mxu1 %v1732_v0  ;;  %1173 = vmatprep.subr.bf16.mxu0 %v1735_v1 }
  0x99   :  { %1519 = vmatprep.subr.bf16.mxu1 %v1736_v2 }
  0x9b   :  { %1174 = vmatpush2.bf16.msra.mxu0 %v1733_v3 }
  0x9c   :  { %1520 = vmatpush3.bf16.msra.mxu1 %v1737_v5  ;;  %1527 = vmatprep.subr.bf16.mxu0 %v1741_v6 }
  0x9e   :  { %1176 = vmatmul.mubr.bf16.vlgmr.msra.gmra.mxu0 %v1738_v7 }
  0x9f   :  { %1260 = vmatmul.mubr.bf16.vlgmr.msra.gmra.mxu1 %v1864_v4  ;;  %1528 = vmatpush3.bf16.msra.mxu0 %v1742_v8  ;;  %v1752_v4 = vld [vmem:[#allocation5 + $0x338] ss:$12 sps:$4 sm:$0xff]  }
  0xa0   :  { %1300 = vmatprep.mubr.bf16.mxu0 %v1869_v44  ;;  %1529 = vmatprep.subr.bf16.mxu0 %v1743_v9 }
  0xa3   :  { %1530 = vmatpush3.bf16.msra.mxu0 %v1744_v10 }
  0xa4   :  { %1531 = vmatprep.subr.bf16.mxu0 %v1745_v11 }
  0xa7   :  { %1532 = vmatpush3.bf16.msra.mxu0 %v1746_v12 }
  0xa8   :  { %1533 = vmatprep.subr.bf16.mxu0 %v1747_v13 }
  0xab   :  { %1534 = vmatpush3.bf16.msra.mxu0 %v1748_v14 }
  0xac   :  { %1535 = vmatprep.subr.bf16.mxu0 %v1749_v15 }
  0xaf   :  { %1536 = vmatpush3.bf16.msra.mxu0 %v1750_v16 }
  0xb0   :  { %1537 = vmatprep.subr.bf16.mxu0 %v1751_v17 }
  0xb3   :  { %1538 = vmatpush3.bf16.msra.mxu0 %v1752_v4 }
  0xb4   :  { %1539 = vmatprep.subr.bf16.mxu0 %v1753_v18 }
  0xb7   :  { %1540 = vmatpush3.bf16.msra.mxu0 %v1754_v19 }
  0xb8   :  { %1541 = vmatprep.subr.bf16.mxu0 %v1755_v20 }
  0xbb   :  { %1542 = vmatpush3.bf16.msra.mxu0 %v1756_v21 }
  0xbe   :  { %1301 = vmatmul.mubr.bf16.vlgmr.msra.gmra.mxu0 %v1738_v7 }
 0x11e   :  { %v1091_v24 = vpop.f32.mrf.mxu0 }
 0x11f   :  { %v1134_v29 = vpop.f32.mrf.mxu1  ;;  %v1092_v34 = vadd.f32 %v1091_v24, %v247_v30 }
 0x120   :  { %v1093_v28 = vpop.f32.mrf.mxu0 }
 0x121   :  { %v1136_v33 = vpop.f32.mrf.mxu1  ;;  %v1094_v35 = vadd.f32 %v1093_v28, %v251_v31  ;;  %v1135_v38 = vadd.f32 %v1134_v29, %v1092_v34 }
 0x122   :  { %v1095_v32 = vpop.f32.mrf.mxu0 }
 0x123   :  { %v1138_v37 = vpop.f32.mrf.mxu1  ;;  %v1096_v39 = vadd.f32 %v1095_v32, %v247_v30  ;;  %v1137_v41 = vadd.f32 %v1136_v33, %v1094_v35 }
 0x124   :  { %v1097_v36 = vpop.f32.mrf.mxu0 }
 0x125   :  { %v1098_v42 = vadd.f32 %v1097_v36, %v251_v31  ;;  %v1140_v44 = vpop.f32.mrf.mxu1  ;;  %v1139_v46 = vadd.f32 %v1138_v37, %v1096_v39 }
 0x127   :  { %v1141_v50 = vadd.f32 %v1140_v44, %v1098_v42 }
 0x13f   :  { %v1499_v48 = vpop.f32.mrf.mxu1 }
 0x141   :  { %v1500_v55 = vpop.f32.mrf.mxu1 }
 0x142   :  { %v1501_v61 = vadd.f32 %v1500_v55, %v1499_v48 }
 0x143   :  { %v1502_v56 = vpop.f32.mrf.mxu1 }
 0x144   :  { %v1221_v63 = vadd.f32 %v1501_v61, %v255_v60 }
 0x145   :  { %v1503_v57 = vpop.f32.mrf.mxu1 }
 0x146   :  { %v1504_v3 = vadd.f32 %v1503_v57, %v1502_v56 }
 0x148   :  { %v1224_v10 = vadd.f32 %v1504_v3, %v255_v60 }
 0x15e   :  { %v1177_v40 = vpop.f32.mrf.mxu0 }
 0x15f   :  { %v1178_v43 = vadd.f32 %v1177_v40, %v1135_v38  ;;  %v1521_v51 = vpop.f32.mrf.mxu1 }
 0x160   :  { %v1179_v45 = vpop.f32.mrf.mxu0 }
 0x161   :  { %1309 = vst [vmem:[#allocation7] sm:$0xff] %v1178_v43  ;;  %v1180_v47 = vadd.f32 %v1179_v45, %v1137_v41  ;;  %v1522_v59 = vpop.f32.mrf.mxu1 }
 0x162   :  { %v1181_v49 = vpop.f32.mrf.mxu0  ;;  %v1523_v0 = vadd.f32 %v1522_v59, %v1521_v51 }
 0x163   :  { %1310 = vst [vmem:[#allocation7 + $0x8] sm:$0xff] %v1180_v47  ;;  %v1182_v52 = vadd.f32 %v1181_v49, %v1139_v46  ;;  %v1524_v62 = vpop.f32.mrf.mxu1 }
 0x164   :  { %v1183_v53 = vpop.f32.mrf.mxu0  ;;  %v1262_v6 = vadd.f32 %v1523_v0, %v1221_v63 }
 0x165   :  { %1312 = vst [vmem:[#allocation7 + $0x18] sm:$0xff] %v1182_v52  ;;  %v1184_v54 = vadd.f32 %v1183_v53, %v1141_v50  ;;  %v1525_v1 = vpop.f32.mrf.mxu1 }
 0x166   :  { %v1526_v7 = vadd.f32 %v1525_v1, %v1524_v62 }
 0x167   :  { %1313 = vst [vmem:[#allocation7 + $0x20] sm:$0xff] %v1184_v54 }
 0x168   :  { %v1265_v13 = vadd.f32 %v1526_v7, %v1224_v10 }
 0x17e   :  { %v1543_v2 = vpop.f32.mrf.mxu0 }
 0x180   :  { %v1544_v5 = vpop.f32.mrf.mxu0 }
 0x181   :  { %v1545_v8 = vadd.f32 %v1544_v5, %v1543_v2 }
 0x182   :  { %v1546_v9 = vpop.f32.mrf.mxu0 }
 0x183   :  { %v1303_v11 = vadd.f32 %v1545_v8, %v1262_v6 }
 0x184   :  { %v1547_v12 = vpop.f32.mrf.mxu0 }
 0x185   :  { %1311 = vst [vmem:[#allocation7 + $0x10] sm:$0xff] %v1303_v11  ;;  %v1548_v14 = vadd.f32 %v1547_v12, %v1546_v9 }
 0x187   :  { %v1306_v15 = vadd.f32 %v1548_v14, %v1265_v13 }
 0x189   :  { %1314 = vst [vmem:[#allocation7 + $0x28] sm:$0xff] %v1306_v15 }
 0x18a   :  { %1808 = shalt.err (!%p1805_p0)
}
 0x18b   :  { %1326 = dma.vmem_to_hbm [thread:$0]  %s1321_s26, 768, %s1887_s3, [#allocation4], %s1824_s15, %s1824_s15, %s1825_s16  }
 0x18c   :  { %1821 = dma.done.wait [#allocation4], 768  }
 0x18d   :  { %1822 = vsyncadd [#allocation4], 4294966528 }
 0x18e   :  { %1330 = vsyncpa [#allocation3], 1 }
 0x18f   :  { %1331 = vsyncpa [#allocation6], 1 }
 0x190   :  { %1332 = vsyncpa [#allocation4], 1 }

</bundles_post_ra>
